<compile_context>
chip_gen: v7x
topology: tpu7x:2x2x1
jax: 0.10.0
libtpu: 0.0.40
codegen_flags: <defaults>
</compile_context>

<pallas_src>
import jax
import jax.numpy as jnp
from jax.experimental import pallas as pl
from jax.experimental.pallas import tpu as pltpu

EPS = 1e-5
VMEM_BUDGET = 48 << 20  # conservative cap: leaves headroom under v7x's 64 MiB VMEM


def _residual_block_kernel(
    x_ref,        # (B, Cin)    bf16
    w1_ref,       # (Cin, Cmid) bf16
    pk1_ref,      # (8, Cmid)   f32: row0 = gamma1, row1 = beta1
    w2_ref,       # (Cmid, tn)  bf16 (Cout tile)
    wi_ref,       # (Cin, tn)   bf16 (Cout tile)
    pk2_ref,      # (8, tn)     f32: row0 = gamma2, row1 = beta2 + identity bias
    o_ref,        # (B, tn)     f32 or bf16
):
    # ---- linear1 (bias dropped: cancelled by train-mode BN) + BN1 + ReLU ----
    # Recomputed per Cout tile: cheap at these shapes, no shared scratch, and it
    # keeps the Cout grid axis fully "parallel" (megacore-shardable on v7x).
    h = jnp.dot(x_ref[...], w1_ref[...], preferred_element_type=jnp.float32)
    mu1 = jnp.mean(h, axis=0, keepdims=True)
    hc = h - mu1
    var1 = jnp.mean(hc * hc, axis=0, keepdims=True)          # two-pass (centered) var
    scale1 = pk1_ref[0:1, :] * jax.lax.rsqrt(var1 + EPS)
    h = jnp.maximum(hc * scale1 + pk1_ref[1:2, :], 0.0)

    # ---- linear2 (bias dropped) + BN2 (per-feature stats -> tile-local is exact) ----
    o = jnp.dot(h.astype(jnp.bfloat16), w2_ref[...], preferred_element_type=jnp.float32)
    mu2 = jnp.mean(o, axis=0, keepdims=True)
    oc = o - mu2
    var2 = jnp.mean(oc * oc, axis=0, keepdims=True)
    scale2 = pk2_ref[0:1, :] * jax.lax.rsqrt(var2 + EPS)
    o = oc * scale2 + pk2_ref[1:2, :]                         # beta2 + bi already folded

    # ---- identity (skip) projection + residual add + ReLU ----
    idn = jnp.dot(x_ref[...], wi_ref[...], preferred_element_type=jnp.float32)
    o_ref[...] = jnp.maximum(o + idn, 0.0).astype(o_ref.dtype)


def prepare_params(params):
    """One-time parameter preprocessing.  Cache the result: bf16 weight casts and the
    packed per-feature rows are each a full HBM pass over the weights, so they must
    not run on every forward call."""
    Cmid = params["w1"].shape[1]
    Cout = params["w2"].shape[1]

    pk1 = jnp.zeros((8, Cmid), jnp.float32)
    pk1 = pk1.at[0, :].set(params["g1"].reshape(-1))
    pk1 = pk1.at[1, :].set(params["be1"].reshape(-1))

    pk2 = jnp.zeros((8, Cout), jnp.float32)
    pk2 = pk2.at[0, :].set(params["g2"].reshape(-1))
    # Fold the identity-layer bias into the BN2 shift row (exact):
    #   BN2(o) + (x@wi + bi) = oc*scale2 + (be2 + bi) + x@wi
    pk2 = pk2.at[1, :].set(params["be2"].reshape(-1) + params["bi"].reshape(-1))

    return {
        "w1": params["w1"].astype(jnp.bfloat16),
        "w2": params["w2"].astype(jnp.bfloat16),
        "wi": params["wi"].astype(jnp.bfloat16),
        "pk1": pk1,
        "pk2": pk2,
    }


def _vmem_estimate(B, Cin, Cmid, bn, out_bytes):
    """Rough double-buffered working-set estimate for one Cout tile of width bn."""
    resident = (B * Cin + Cin * Cmid) * 2 + 8 * Cmid * 4            # x, w1 (bf16), pk1
    per_tile = (Cmid + Cin) * bn * 2 + 8 * bn * 4 + B * bn * out_bytes
    return 2 * resident + 2 * per_tile                              # Pallas double-buffers


def residual_block(x, params, *, block_n=None, out_dtype=jnp.float32):
    """x: (B, Cin) float32.  params: output of prepare_params (raw init_params dict is
    also accepted and prepared on the fly, but callers should cache prepare_params)."""
    if "pk1" not in params:
        params = prepare_params(params)

    B, Cin = x.shape
    Cmid = params["w1"].shape[1]
    Cout = params["w2"].shape[1]
    out_bytes = jnp.dtype(out_dtype).itemsize

    # Lane-dense output tiling: largest 128-multiple tile (usually all of Cout) that
    # fits the VMEM budget -> fewest grid steps, unmasked lane-dense stores.
    if block_n is None:
        cands = [Cout]
        if Cout % 128 == 0 and Cout > 128:
            cands += [m for m in range(Cout - 128, 127, -128) if Cout % m == 0]
        block_n = cands[-1]
        for bn in cands:  # descending; first fit is the widest
            if _vmem_estimate(B, Cin, Cmid, bn, out_bytes) <= VMEM_BUDGET:
                block_n = bn
                break
    assert Cout % block_n == 0, "Cout must be divisible by block_n"
    n_j = Cout // block_n

    x16 = x.astype(jnp.bfloat16)  # per-call (x changes); weights are already bf16/packed

    # Cost estimate for XLA's scheduler (linear1 is recomputed per Cout tile).
    flops = 2 * B * (Cin * Cmid * n_j + Cmid * Cout + Cin * Cout)
    bytes_accessed = (x16.size * 2 + params["w1"].size * 2 + params["w2"].size * 2
                      + params["wi"].size * 2 + params["pk1"].size * 4
                      + params["pk2"].size * 4 + B * Cout * out_bytes)
    cost = pl.CostEstimate(flops=flops, transcendentals=Cmid * n_j + Cout,
                           bytes_accessed=bytes_accessed)

    vmem_limit = int(min(max(_vmem_estimate(B, Cin, Cmid, block_n, out_bytes) + (4 << 20),
                             16 << 20), VMEM_BUDGET))

    return pl.pallas_call(
        _residual_block_kernel,
        out_shape=jax.ShapeDtypeStruct((B, Cout), out_dtype),
        grid_spec=pltpu.PrefetchScalarGridSpec(
            num_scalar_prefetch=0,
            grid=(n_j,),
            in_specs=[
                pl.BlockSpec((B, Cin), lambda j: (0, 0)),
                pl.BlockSpec((Cin, Cmid), lambda j: (0, 0)),
                pl.BlockSpec((8, Cmid), lambda j: (0, 0)),
                pl.BlockSpec((Cmid, block_n), lambda j: (0, j)),
                pl.BlockSpec((Cin, block_n), lambda j: (0, j)),
                pl.BlockSpec((8, block_n), lambda j: (0, j)),
            ],
            out_specs=pl.BlockSpec((B, block_n), lambda j: (0, j)),
        ),
        compiler_params=pltpu.CompilerParams(
            dimension_semantics=("parallel",),   # tiles are independent (h recomputed)
            vmem_limit_bytes=vmem_limit,
        ),
        cost_estimate=cost,
    )(x16, params["w1"], params["pk1"], params["w2"], params["wi"], params["pk2"])


def init_params(key, in_channels, mid_channels, out_channels):
    """Deterministic synthetic init matching the PyTorch module's shapes.

    Weights stored (in, out) (transpose of PyTorch's (out, in)); per-feature params as
    (1, C) rows.  b1 / b2 are generated for the reference only - the kernel drops them
    because they are exactly cancelled by train-mode BatchNorm."""
    ks = jax.random.split(key, 6)
    u = lambda k, shape, scale: jax.random.uniform(
        k, shape, dtype=jnp.float32, minval=-scale, maxval=scale)
    s1 = 1.0 / (in_channels ** 0.5)
    s2 = 1.0 / (mid_channels ** 0.5)
    return {
        "w1": u(ks[0], (in_channels, mid_channels), s1),
        "b1": u(ks[1], (1, mid_channels), s1),
        "g1": jnp.ones((1, mid_channels), jnp.float32),
        "be1": jnp.zeros((1, mid_channels), jnp.float32),
        "w2": u(ks[2], (mid_channels, out_channels), s2),
        "b2": u(ks[3], (1, out_channels), s2),
        "g2": jnp.ones((1, out_channels), jnp.float32),
        "be2": jnp.zeros((1, out_channels), jnp.float32),
        "wi": u(ks[4], (in_channels, out_channels), s1),
        "bi": u(ks[5], (1, out_channels), s1),
    }


def _reference(x, p):
    """Pure-JAX f32 reference of the PyTorch forward (train-mode BN, biases included,
    no dropout) - the exact module math the kernel approximates with bf16 matmuls."""
    h = x @ p["w1"] + p["b1"]
    mu, var = jnp.mean(h, 0, keepdims=True), jnp.var(h, 0, keepdims=True)
    h = (h - mu) / jnp.sqrt(var + EPS) * p["g1"] + p["be1"]
    h = jnp.maximum(h, 0.0)
    o = h @ p["w2"] + p["b2"]
    mu, var = jnp.mean(o, 0, keepdims=True), jnp.var(o, 0, keepdims=True)
    o = (o - mu) / jnp.sqrt(var + EPS) * p["g2"] + p["be2"]
    idn = x @ p["wi"] + p["bi"]
    return jnp.maximum(o + idn, 0.0)


if __name__ == "__main__":
    key = jax.random.PRNGKey(0)

    # (B, Cin, Cmid, Cout, forced block_n, out_dtype)
    cases = [
        (8, 32, 64, 32, None, jnp.float32),      # tiny shapes, single full-Cout tile
        (16, 64, 128, 256, None, jnp.float32),   # single 256-wide lane-dense tile
        (16, 64, 128, 256, 128, jnp.float32),    # forced 2-tile Cout grid (recompute path)
        (16, 64, 128, 256, None, jnp.bfloat16),  # bf16 output writeback variant
    ]

    for idx, (B, Cin, Cmid, Cout, bn, odt) in enumerate(cases):
        k_x, k_p = jax.random.split(jax.random.fold_in(key, idx))
        x = jax.random.normal(k_x, (B, Cin), dtype=jnp.float32)
        params = init_params(k_p, Cin, Cmid, Cout)
        prep = prepare_params(params)   # cached once per parameter set

        out = jax.block_until_ready(residual_block(x, prep, block_n=bn, out_dtype=odt))
        ref = _reference(x, params)

        assert out.shape == (B, Cout) and out.dtype == odt
        out_f32 = out.astype(jnp.float32)
        tol = 3e-2 if odt == jnp.float32 else 6e-2
        max_diff = float(jnp.max(jnp.abs(out_f32 - ref)))
        assert jnp.allclose(out_f32, ref, atol=tol, rtol=tol), (
            f"mismatch vs reference for case {(B, Cin, Cmid, Cout, bn, odt)}: "
            f"max abs diff {max_diff}")

    print("KERNEL_OK")
</pallas_src>

<mosaic_0001>
module attributes {stable_mosaic.version = 11 : i64} {
  func.func @_residual_block_kernel(%arg0: i32, %arg1: memref<8x32xbf16, #tpu.memory_space<vmem>>, %arg2: memref<32x64xbf16, #tpu.memory_space<vmem>>, %arg3: memref<8x64xf32, #tpu.memory_space<vmem>>, %arg4: memref<64x32xbf16, #tpu.memory_space<vmem>>, %arg5: memref<32x32xbf16, #tpu.memory_space<vmem>>, %arg6: memref<8x32xf32, #tpu.memory_space<vmem>>, %arg7: memref<8x32xf32, #tpu.memory_space<vmem>>) attributes {dimension_semantics = [#tpu.dimension_semantics<parallel>], iteration_bounds = array<i64: 1>, scalar_prefetch = 0 : i64, scratch_operands = 0 : i64, tpu.core_type = #tpu.core_type<tc>, window_params = [{pipeline_mode = #tpu.pipeline_mode<synchronous>, transform_indices = @transform_0, window_bounds = array<i64: 8, 32>}, {pipeline_mode = #tpu.pipeline_mode<synchronous>, transform_indices = @transform_1, window_bounds = array<i64: 32, 64>}, {pipeline_mode = #tpu.pipeline_mode<synchronous>, transform_indices = @transform_2, window_bounds = array<i64: 8, 64>}, {transform_indices = @transform_3, window_bounds = array<i64: 64, 32>}, {transform_indices = @transform_4, window_bounds = array<i64: 32, 32>}, {transform_indices = @transform_5, window_bounds = array<i64: 8, 32>}, {transform_indices = @transform_6, window_bounds = array<i64: 8, 32>}]} {
    %c0 = arith.constant 0 : index
    %c0_0 = arith.constant 0 : index
    %0 = vector.load %arg1[%c0, %c0_0] : memref<8x32xbf16, #tpu.memory_space<vmem>>, vector<8x32xbf16>
    %c0_1 = arith.constant 0 : index
    %c0_2 = arith.constant 0 : index
    %1 = vector.load %arg2[%c0_1, %c0_2] : memref<32x64xbf16, #tpu.memory_space<vmem>>, vector<32x64xbf16>
    %cst = arith.constant dense<0.000000e+00> : vector<8x64xf32>
    %2 = tpu.matmul %0, %1, %cst {dimension_numbers = #tpu.dot_dimension_numbers<[1], [0], [0], [1], [0, 0, 1, 1], [], []>} : vector<8x32xbf16>, vector<32x64xbf16>, vector<8x64xf32> -> vector<8x64xf32>
    %cst_3 = arith.constant dense<0.000000e+00> : vector<64xf32>
    %3 = vector.multi_reduction <add>, %2, %cst_3 [0] : vector<8x64xf32> to vector<64xf32>
    %4 = vector.shape_cast %3 : vector<64xf32> to vector<1x64xf32>
    %cst_4 = arith.constant 8.000000e+00 : f32
    %5 = vector.broadcast %cst_4 : f32 to vector<1x64xf32>
    %6 = arith.divf %4, %5 : vector<1x64xf32>
    %7 = vector.broadcast %6 : vector<1x64xf32> to vector<8x64xf32>
    %8 = arith.subf %2, %7 : vector<8x64xf32>
    %9 = arith.mulf %8, %8 : vector<8x64xf32>
    %cst_5 = arith.constant dense<0.000000e+00> : vector<64xf32>
    %10 = vector.multi_reduction <add>, %9, %cst_5 [0] : vector<8x64xf32> to vector<64xf32>
    %11 = vector.shape_cast %10 : vector<64xf32> to vector<1x64xf32>
    %cst_6 = arith.constant 8.000000e+00 : f32
    %12 = vector.broadcast %cst_6 : f32 to vector<1x64xf32>
    %13 = arith.divf %11, %12 : vector<1x64xf32>
    %c0_7 = arith.constant 0 : index
    %c0_8 = arith.constant 0 : index
    %14 = vector.load %arg3[%c0_7, %c0_8] : memref<8x64xf32, #tpu.memory_space<vmem>>, vector<1x64xf32>
    %cst_9 = arith.constant 9.99999974E-6 : f32
    %15 = vector.broadcast %cst_9 : f32 to vector<1x64xf32>
    %16 = arith.addf %13, %15 : vector<1x64xf32>
    %17 = math.rsqrt %16 : vector<1x64xf32>
    %18 = arith.mulf %14, %17 : vector<1x64xf32>
    %19 = vector.broadcast %18 : vector<1x64xf32> to vector<8x64xf32>
    %20 = arith.mulf %8, %19 : vector<8x64xf32>
    %c1 = arith.constant 1 : index
    %c0_10 = arith.constant 0 : index
    %21 = vector.load %arg3[%c1, %c0_10] : memref<8x64xf32, #tpu.memory_space<vmem>>, vector<1x64xf32>
    %22 = vector.broadcast %21 : vector<1x64xf32> to vector<8x64xf32>
    %23 = arith.addf %20, %22 : vector<8x64xf32>
    %cst_11 = arith.constant 0.000000e+00 : f32
    %24 = vector.broadcast %cst_11 : f32 to vector<8x64xf32>
    %25 = arith.maximumf %23, %24 : vector<8x64xf32>
    %26 = arith.truncf %25 : vector<8x64xf32> to vector<8x64xbf16>
    %c0_12 = arith.constant 0 : index
    %c0_13 = arith.constant 0 : index
    %27 = vector.load %arg4[%c0_12, %c0_13] : memref<64x32xbf16, #tpu.memory_space<vmem>>, vector<64x32xbf16>
    %cst_14 = arith.constant dense<0.000000e+00> : vector<8x32xf32>
    %28 = tpu.matmul %26, %27, %cst_14 {dimension_numbers = #tpu.dot_dimension_numbers<[1], [0], [0], [1], [0, 0, 1, 1], [], []>} : vector<8x64xbf16>, vector<64x32xbf16>, vector<8x32xf32> -> vector<8x32xf32>
    %cst_15 = arith.constant dense<0.000000e+00> : vector<32xf32>
    %29 = vector.multi_reduction <add>, %28, %cst_15 [0] : vector<8x32xf32> to vector<32xf32>
    %30 = vector.shape_cast %29 : vector<32xf32> to vector<1x32xf32>
    %cst_16 = arith.constant 8.000000e+00 : f32
    %31 = vector.broadcast %cst_16 : f32 to vector<1x32xf32>
    %32 = arith.divf %30, %31 : vector<1x32xf32>
    %33 = vector.broadcast %32 : vector<1x32xf32> to vector<8x32xf32>
    %34 = arith.subf %28, %33 : vector<8x32xf32>
    %35 = arith.mulf %34, %34 : vector<8x32xf32>
    %cst_17 = arith.constant dense<0.000000e+00> : vector<32xf32>
    %36 = vector.multi_reduction <add>, %35, %cst_17 [0] : vector<8x32xf32> to vector<32xf32>
    %37 = vector.shape_cast %36 : vector<32xf32> to vector<1x32xf32>
    %cst_18 = arith.constant 8.000000e+00 : f32
    %38 = vector.broadcast %cst_18 : f32 to vector<1x32xf32>
    %39 = arith.divf %37, %38 : vector<1x32xf32>
    %c0_19 = arith.constant 0 : index
    %c0_20 = arith.constant 0 : index
    %40 = vector.load %arg6[%c0_19, %c0_20] : memref<8x32xf32, #tpu.memory_space<vmem>>, vector<1x32xf32>
    %cst_21 = arith.constant 9.99999974E-6 : f32
    %41 = vector.broadcast %cst_21 : f32 to vector<1x32xf32>
    %42 = arith.addf %39, %41 : vector<1x32xf32>
    %43 = math.rsqrt %42 : vector<1x32xf32>
    %44 = arith.mulf %40, %43 : vector<1x32xf32>
    %45 = vector.broadcast %44 : vector<1x32xf32> to vector<8x32xf32>
    %46 = arith.mulf %34, %45 : vector<8x32xf32>
    %c1_22 = arith.constant 1 : index
    %c0_23 = arith.constant 0 : index
    %47 = vector.load %arg6[%c1_22, %c0_23] : memref<8x32xf32, #tpu.memory_space<vmem>>, vector<1x32xf32>
    %48 = vector.broadcast %47 : vector<1x32xf32> to vector<8x32xf32>
    %49 = arith.addf %46, %48 : vector<8x32xf32>
    %c0_24 = arith.constant 0 : index
    %c0_25 = arith.constant 0 : index
    %50 = vector.load %arg1[%c0_24, %c0_25] : memref<8x32xbf16, #tpu.memory_space<vmem>>, vector<8x32xbf16>
    %c0_26 = arith.constant 0 : index
    %c0_27 = arith.constant 0 : index
    %51 = vector.load %arg5[%c0_26, %c0_27] : memref<32x32xbf16, #tpu.memory_space<vmem>>, vector<32x32xbf16>
    %cst_28 = arith.constant dense<0.000000e+00> : vector<8x32xf32>
    %52 = tpu.matmul %50, %51, %cst_28 {dimension_numbers = #tpu.dot_dimension_numbers<[1], [0], [0], [1], [0, 0, 1, 1], [], []>} : vector<8x32xbf16>, vector<32x32xbf16>, vector<8x32xf32> -> vector<8x32xf32>
    %53 = arith.addf %49, %52 : vector<8x32xf32>
    %cst_29 = arith.constant 0.000000e+00 : f32
    %54 = vector.broadcast %cst_29 : f32 to vector<8x32xf32>
    %55 = arith.maximumf %53, %54 : vector<8x32xf32>
    %c0_30 = arith.constant 0 : index
    %c0_31 = arith.constant 0 : index
    %56 = vector.load %arg7[%c0_30, %c0_31] : memref<8x32xf32, #tpu.memory_space<vmem>>, vector<8x32xf32>
    tpu.vector_store %arg7[%c0_30, %c0_31], %55 {strides = array<i32>} : memref<8x32xf32, #tpu.memory_space<vmem>>, vector<8x32xf32>,
    return
  }
  func.func @transform_0(%arg0: i32) -> (i32, i32) {
    %c0_i32 = arith.constant 0 : i32
    %c0_i32_0 = arith.constant 0 : i32
    %c0_i32_1 = arith.constant 0 : i32
    return %c0_i32, %c0_i32_0 : i32, i32
  }
  func.func @transform_1(%arg0: i32) -> (i32, i32) {
    %c0_i32 = arith.constant 0 : i32
    %c0_i32_0 = arith.constant 0 : i32
    %c0_i32_1 = arith.constant 0 : i32
    return %c0_i32, %c0_i32_0 : i32, i32
  }
  func.func @transform_2(%arg0: i32) -> (i32, i32) {
    %c0_i32 = arith.constant 0 : i32
    %c0_i32_0 = arith.constant 0 : i32
    %c0_i32_1 = arith.constant 0 : i32
    return %c0_i32, %c0_i32_0 : i32, i32
  }
  func.func @transform_3(%arg0: i32) -> (i32, i32) {
    %c0_i32 = arith.constant 0 : i32
    %c0_i32_0 = arith.constant 0 : i32
    return %c0_i32, %arg0 : i32, i32
  }
  func.func @transform_4(%arg0: i32) -> (i32, i32) {
    %c0_i32 = arith.constant 0 : i32
    %c0_i32_0 = arith.constant 0 : i32
    return %c0_i32, %arg0 : i32, i32
  }
  func.func @transform_5(%arg0: i32) -> (i32, i32) {
    %c0_i32 = arith.constant 0 : i32
    %c0_i32_0 = arith.constant 0 : i32
    return %c0_i32, %arg0 : i32, i32
  }
  func.func @transform_6(%arg0: i32) -> (i32, i32) {
    %c0_i32 = arith.constant 0 : i32
    %c0_i32_0 = arith.constant 0 : i32
    return %c0_i32, %arg0 : i32, i32
  }
}

</mosaic_0001>

<bundles_post_ra>
// kernel: tpu_custom_call.1
= control target key start
LH: loop header
LB: loop body
LE: loop exit
PB: predicated region body
PF: predicated region fallthrough
CT: control target
= control target key end

     0   :  { %11 = vsyncpa [#allocation3], 0  ;;  %s540_s0 = inlined_call_operand.hbm [shape: bf16[8,32], index: 0, kind: input, shape index: {}]   ;;  %s541_s1 = inlined_call_operand.vmem [shape: bf16[32,64], index: 1, kind: input, shape index: {}]   ;;  %s542_s2 = inlined_call_operand.vmem [shape: f32[8,64], index: 2, kind: input, shape index: {}]   ;;  %s543_s3 = inlined_call_operand.vmem [shape: bf16[64,32], index: 3, kind: input, shape index: {}]   ;;  %s544_s4 = inlined_call_operand.vmem [shape: bf16[32,32], index: 4, kind: input, shape index: {}]   ;;  %s545_s5 = inlined_call_operand.vmem [shape: f32[8,32], index: 5, kind: input, shape index: {}]   ;;  %s546_s6 = inlined_call_operand.hbm [shape: f32[8,32], index: 6, kind: output, shape index: {}]  }
   0x1   :  { %12 = vsyncpa [#allocation4], 0  ;;  %s433_s21 = smov [#allocation2]   ;;  %s385_s25 = scalar_lea.hbm %s540_s0, 64 }
   0x2   :  { %s19_s22 = sshll.u32 %s433_s21, 4  ;;  %p386_p0 = scmp.ne.s32.totalorder %s540_s0, %s385_s25  ;;  %s20_s22 = int_to_ptr.vmem [resolvable:$true] %s19_s22 }
   0x3   :  { %p389_p1 = scmp.lt.u32.totalorder %s385_s25, %s540_s0 }
   0x5   :  { %p391_p2 = pnand %p389_p1, %p386_p0 }
   0x7   :  { %394 = shalt.err (!%p391_p2)
}
   0x8   :  { %s395_s30 = scalar_lea.vmem %s20_s22, 64  ;;  %p400_p4 = scmp.lt.s32.totalorder %s20_s22, %s20_s22 }
   0x9   :  { %p396_p3 = scmp.ne.s32.totalorder %s20_s22, %s395_s30  ;;  %p401_p5 = scmp.lt.s32.totalorder %s395_s30, %s395_s30 }
   0xb   :  { %p402_p6 = por %p401_p5, %p400_p4 }
   0xd   :  { %p403_p7 = pnand %p402_p6, %p396_p3 }
   0xf   :  { %406 = shalt.err (!%p403_p7)
}
  0x10   :  { %22 = dma.hbm_to_vmem [thread:$0]  %s540_s0, 64, %s20_s22, [#allocation3]  }
  0x11   :  { %429 = dma.done.wait [#allocation3], 64  }
  0x12   :  { %430 = vsyncadd [#allocation3], 4294967232  ;;  %v434_v0 = vmov 0.0   ;;  %vm435_vm0 = vmmov 0   ;;  %v373_v1 = vld [vmem:[%s541_s1] sm:$0xff]   ;;  %v374_v2 = vld [vmem:[%s541_s1 + $0x8] sm:$0xff]   ;;  %v122_v33 = vlaneseq }
  0x13   :  { %341 = vmatprep.subr.bf16.mxu0 %v434_v0  ;;  %345 = vmatprep.mubr.msk.bf16.mxu0 %vm435_vm0, %v434_v0  ;;  %v37_v3 = vld [vmem:[#allocation2] sm:$0xf]  ;;  %vm54_vm1 = vcmask 261120   ;;  %v376_v5 = vld [vmem:[%s543_s3 + $0x8] sm:$0xff]   ;;  %v377_v6 = vld [vmem:[%s543_s3 + $0x10] sm:$0xff]   ;;  %vm98_vm2 = vcmask 523264  }
  0x14   :  { %349 = vmatprep.subr.bf16.mxu1 %v434_v0  ;;  %357 = vmatprep.mubr.msk.bf16.mxu1 %vm435_vm0, %v434_v0  ;;  %v375_v4 = vld [vmem:[%s543_s3] sm:$0xff]   ;;  %v378_v7 = vld [vmem:[%s543_s3 + $0x18] sm:$0xff]   ;;  %v380_v9 = vld [vmem:[%s544_s4 + $0x8] sm:$0xff]   ;;  %v123_v34 = vshrl.u32 %v122_v33, 7  ;;  %s436_s28 = smov [#allocation5]  }
  0x15   :  { %342 = vmatpush3.bf16.msra.mxu0 %v373_v1  ;;  %350 = vmatpush3.bf16.msra.mxu1 %v375_v4  ;;  %v379_v8 = vld [vmem:[%s544_s4] sm:$0xff]   ;;  %s308_s29 = sshll.u32 %s436_s28, 4  ;;  %s309_s29 = int_to_ptr.vmem [resolvable:$true] %s308_s29 }
  0x16   :  { %343 = vmatprep.subr.bf16.mxu0 %v434_v0  ;;  %351 = vmatprep.subr.bf16.mxu1 %v434_v0  ;;  %v118_v35 = vld [vmem:[%s542_s2] sm:$0x1]  ;;  %v124_v36 = vsub.s32 0, %v123_v34  ;;  %v320_v40 = vld [vmem:[%s542_s2 + $0x1] ss:$0 sm:$0xff]  ;;  %s407_s30 = scalar_lea.vmem %s309_s29, 128  ;;  %p412_p9 = scmp.lt.s32.totalorder %s309_s29, %s309_s29 }
  0x17   :  { %p408_p8 = scmp.ne.s32.totalorder %s309_s29, %s407_s30  ;;  %p413_p10 = scmp.lt.s32.totalorder %s407_s30, %s407_s30 }
  0x19   :  { %344 = vmatpush3.bf16.msra.mxu0 %v374_v2  ;;  %352 = vmatpush3.bf16.msra.mxu1 %v376_v5  ;;  %p414_p11 = por %p413_p10, %p412_p9 }
  0x1a   :  { %361 = vmatprep.subr.bf16.mxu0 %v434_v0  ;;  %353 = vmatprep.subr.bf16.mxu1 %v434_v0 }
  0x1b   :  { %p415_p12 = pnand %p414_p11, %p408_p8 }
  0x1c   :  { %346 = vmatmul.mubr.msk.bf16.vlgmr.msra.gmra.mrb[0].mxu0 %vm54_vm1, %v37_v3 }
  0x1d   :  { %365 = vmatprep.mubr.msk.bf16.mxu0 %vm435_vm0, %v434_v0  ;;  %354 = vmatpush3.bf16.msra.mxu1 %v377_v6 }
  0x1e   :  { %355 = vmatprep.subr.bf16.mxu1 %v434_v0  ;;  %362 = vmatpush3.bf16.msra.mxu0 %v379_v8  ;;  %v228_v8 = vld [vmem:[%s545_s5] sm:$0x1] }
  0x1f   :  { %363 = vmatprep.subr.bf16.mxu0 %v434_v0 }
  0x21   :  { %356 = vmatpush3.bf16.msra.mxu1 %v378_v7 }
  0x22   :  { %364 = vmatpush3.bf16.msra.mxu0 %v380_v9 }
  0x25   :  { %366 = vmatmul.mubr.msk.bf16.vlgmr.msra.gmra.mrb[4].mxu0 %vm54_vm1, %v37_v3 }
  0xef   :  { %v92_v10 = vpop.f32.mrb[0].mxu0 }
  0xf0   :  { %v99_v11 = vsel %vm98_vm2, %v92_v10, 0.0  ;;  %v347_v12 = vpop.f32.mrb[1].mxu0 }
  0xf1   :  { %v100_v13 = vrot.slane %v99_v11, 4  ;;  %v95_v14 = vpop.f32.mrb[2].mxu0  ;;  %v326_v12 = vld [vmem:[%s545_s5 + $0x1] ss:$0 sm:$0xff] }
  0xf2   :  { %v348_v15 = vpop.f32.mrb[3].mxu0 }
  0xf3   :  { %v101_v16 = vadd.f32 %v100_v13, %v99_v11 }
  0xf5   :  { %v102_v17 = vrot.slane %v101_v16, 2 }
  0xf7   :  { %v103_v18 = vadd.f32 %v102_v17, %v101_v16 }
  0xf8   :  { %v293_v45 = vpop.f32.mrb[4].mxu0 }
  0xf9   :  { %v104_v19 = vrot.slane %v103_v18, 1  ;;  %v367_v46 = vpop.f32.mrb[5].mxu0 }
  0xfa   :  { %v296_v47 = vpop.f32.mrb[6].mxu0 }
  0xfb   :  { %v105_v20 = vadd.f32 %v104_v19, %v103_v18  ;;  %v368_v48 = vpop.f32.mrb[7].mxu0 }
  0xfd   :  { %v107_v21 = vmul.f32 0.125, %v105_v20 }
  0xff   :  { %v108_v22 = vsub.f32 %v92_v10, %v107_v21 }
 0x101   :  { %v109_v23 = vmul.f32 %v108_v22, %v108_v22 }
 0x103   :  { %v110_v24 = vsel %vm98_vm2, %v109_v23, 0.0 }
 0x104   :  { %v111_v25 = vrot.slane %v110_v24, 4 }
 0x106   :  { %v112_v26 = vadd.f32 %v111_v25, %v110_v24 }
 0x108   :  { %v113_v27 = vrot.slane %v112_v26, 2 }
 0x10a   :  { %v114_v28 = vadd.f32 %v113_v27, %v112_v26 }
 0x10c   :  { %v115_v29 = vrot.slane %v114_v28, 1 }
 0x10e   :  { %v116_v30 = vadd.f32 %v115_v29, %v114_v28 }
 0x110   :  { %v117_v31 = vmul.f32 0.125, %v116_v30 }
 0x112   :  { %v119_v32 = vadd.f32 1e-05, %v117_v31 }
 0x114   :  { %381 = vrsqrt.f32 %v119_v32 }
 0x11e   :  { %v382_v37 = vpop.eup %381 }
 0x11f   :  { %v121_v38 = vmul.f32 %v382_v37, %v118_v35 }
 0x121   :  { %v125_v39 = vrot.slane %v121_v38, %v124_v36 }
 0x123   :  { %v126_v41 = vmul.f32 %v125_v39, %v108_v22 }
 0x125   :  { %v132_v42 = vadd.f32 %v320_v40, %v126_v41 }
 0x127   :  { %v133_v43 = vmax.f32 %v132_v42, 0.0 }
 0x129   :  { %v134_v44 = vpack.c.bf16 %v133_v43, %v133_v43 }
 0x12b   :  { %358 = vmatmul.mubr.msk.bf16.vlgmr.msra.gmra.mrb[0].mxu1 %vm98_vm2, %v134_v44 }
 0x1fe   :  { %v204_v49 = vpop.f32.mrb[0].mxu1 }
 0x1ff   :  { %v210_v50 = vsel %vm54_vm1, %v204_v49, 0.0  ;;  %v359_v51 = vpop.f32.mrb[1].mxu1 }
 0x200   :  { %v211_v52 = vrot.slane %v210_v50, 4  ;;  %v207_v53 = vpop.f32.mrb[2].mxu1 }
 0x201   :  { %v360_v54 = vpop.f32.mrb[3].mxu1 }
 0x202   :  { %v212_v55 = vadd.f32 %v211_v52, %v210_v50 }
 0x204   :  { %v213_v56 = vrot.slane %v212_v55, 2 }
 0x206   :  { %v214_v57 = vadd.f32 %v213_v56, %v212_v55 }
 0x208   :  { %v215_v58 = vrot.slane %v214_v57, 1 }
 0x20a   :  { %v216_v59 = vadd.f32 %v215_v58, %v214_v57 }
 0x20c   :  { %v217_v60 = vmul.f32 0.125, %v216_v59 }
 0x20e   :  { %v218_v61 = vsub.f32 %v204_v49, %v217_v60 }
 0x210   :  { %v219_v62 = vmul.f32 %v218_v61, %v218_v61 }
 0x212   :  { %v220_v63 = vsel %vm54_vm1, %v219_v62, 0.0 }
 0x213   :  { %v221_v0 = vrot.slane %v220_v63, 4 }
 0x215   :  { %v222_v1 = vadd.f32 %v221_v0, %v220_v63 }
 0x217   :  { %v223_v2 = vrot.slane %v222_v1, 2 }
 0x219   :  { %v224_v3 = vadd.f32 %v223_v2, %v222_v1 }
 0x21b   :  { %v225_v4 = vrot.slane %v224_v3, 1 }
 0x21d   :  { %v226_v5 = vadd.f32 %v225_v4, %v224_v3 }
 0x21f   :  { %v227_v6 = vmul.f32 0.125, %v226_v5 }
 0x221   :  { %v229_v7 = vadd.f32 1e-05, %v227_v6 }
 0x223   :  { %383 = vrsqrt.f32 %v229_v7 }
 0x22d   :  { %v384_v9 = vpop.eup %383 }
 0x22e   :  { %v231_v10 = vmul.f32 %v384_v9, %v228_v8 }
 0x230   :  { %v235_v11 = vrot.slane %v231_v10, %v124_v36 }
 0x232   :  { %v236_v13 = vmul.f32 %v235_v11, %v218_v61 }
 0x234   :  { %v242_v14 = vadd.f32 %v326_v12, %v236_v13 }
 0x236   :  { %v299_v15 = vadd.f32 %v293_v45, %v242_v14 }
 0x238   :  { %v300_v16 = vmax.f32 %v299_v15, 0.0 }
 0x23a   :  { %301 = vst.msk [vmem:[#allocation5] sm:$0xff] %vm54_vm1, %v300_v16 }
 0x23b   :  { %418 = shalt.err (!%p415_p12)
}
 0x23c   :  { %s419_s5 = scalar_lea.hbm %s546_s6, 128 }
 0x23d   :  { %p420_p13 = scmp.ne.s32.totalorder %s546_s6, %s419_s5  ;;  %p423_p0 = scmp.lt.u32.totalorder %s419_s5, %s546_s6 }
 0x23f   :  { %p425_p1 = pnand %p423_p0, %p420_p13 }
 0x241   :  { %428 = shalt.err (!%p425_p1)
}
 0x242   :  { %311 = dma.vmem_to_hbm [thread:$0]  %s309_s29, 128, %s546_s6, [#allocation4]  }
 0x243   :  { %431 = dma.done.wait [#allocation4], 128  }
 0x244   :  { %432 = vsyncadd [#allocation4], 4294967168 }
 0x245   :  { %315 = vsyncpa [#allocation3], 1 }
 0x246   :  { %316 = vsyncpa [#allocation4], 1 }

</bundles_post_ra>
